<compile_context>
chip_gen: v7x
topology: tpu7x:2x2x1
jax: 0.10.0
libtpu: 0.0.40
codegen_flags: <defaults>
</compile_context>

<pallas_src>
import functools
import math

import jax
import jax.numpy as jnp
from jax.experimental import pallas as pl
from jax.experimental.pallas import tpu as pltpu

_INV_SQRT2 = 0.7071067811865476
_TANH_C = 0.7978845608028654  # sqrt(2/pi)


def _gelu_f32(h, approximate):
    if approximate:
        # tanh-approx GELU lowers to the EUP slot (free under MXU); optional.
        return 0.5 * h * (1.0 + jnp.tanh(_TANH_C * (h + 0.044715 * h * h * h)))
    # Exact erf GELU — matches torch.nn.GELU() default.
    return 0.5 * h * (1.0 + jax.lax.erf(h * _INV_SQRT2))


def _ffn_kernel_single(approximate_gelu, x_ref, w1_ref, b1_ref, w2_ref, b2_ref, o_ref):
    # Full hidden dim resident: one pass, no accumulator, weights DMA'd once for the grid.
    h = jnp.dot(x_ref[...], w1_ref[...], preferred_element_type=jnp.float32)
    h = h + b1_ref[...].astype(jnp.float32)
    h = _gelu_f32(h, approximate_gelu)
    # Dropout (p=0.5) in eval mode == identity.
    out = jnp.dot(h.astype(w2_ref.dtype), w2_ref[...], preferred_element_type=jnp.float32)
    o_ref[...] = (out + b2_ref[...].astype(jnp.float32)).astype(o_ref.dtype)


def _ffn_kernel_multi(approximate_gelu, x_ref, w1_ref, b1_ref, w2_ref, b2_ref, o_ref,
                      acc_ref):
    # H-tiled reduction: grid axis 1 walks hidden-dim slices; acc_ref is resident across it.
    h_step = pl.program_id(1)
    n_h = pl.num_programs(1)

    h = jnp.dot(x_ref[...], w1_ref[...], preferred_element_type=jnp.float32)
    h = h + b1_ref[...].astype(jnp.float32)
    h = _gelu_f32(h, approximate_gelu)
    # Dropout (p=0.5) in eval mode == identity.
    p = jnp.dot(h.astype(w2_ref.dtype), w2_ref[...], preferred_element_type=jnp.float32)

    @pl.when(h_step == 0)
    def _first():
        acc_ref[...] = p                      # first partial: direct write (no zero-fill)

    @pl.when(h_step > 0)
    def _rest():
        acc_ref[...] += p

    @pl.when(h_step == n_h - 1)
    def _finalize():
        o_ref[...] = (acc_ref[...] + b2_ref[...].astype(jnp.float32)).astype(o_ref.dtype)


def _round_up(x, m):
    return ((x + m - 1) // m) * m


def _vmem_capacity_bytes():
    """Per-core VMEM capacity, generation-aware with a conservative fallback."""
    try:
        info = pltpu.get_tpu_info()
        cap = getattr(info, "vmem_capacity_bytes", None)
        if cap:
            return int(cap)
    except Exception:
        pass
    return 64 * 1024 * 1024  # v7x per-TC size == safe lower bound everywhere


def _choose_tiles(M, D, H, isz, osz, budget):
    """Pick (tm, th). Prefer th == H (weights fetched once) with the largest tm that fits."""
    mp8 = _round_up(max(M, 1), 8)
    tm_cands = [t for t in (1024, 768, 512, 384, 256, 128, 64, 32, 16, 8) if t <= mp8]
    if not tm_cands:
        tm_cands = [8]

    th_cands = [H]
    if H % 128 == 0:
        th_cands += [t for t in range(H - 128, 127, -128) if H % t == 0]

    def usage(tm, th):
        u = (2 * tm * D * isz                 # x tile (double-buffered)
             + 2 * D * th * isz + 2 * th * 4  # W1 slice + b1 slice
             + 2 * th * D * isz + 2 * D * 4   # W2 slice + b2
             + 2 * tm * D * osz)              # output tile
        if th < H:
            u += tm * D * 4                   # f32 accumulator scratch
        return u

    for th in th_cands:                       # th == H first: no weight re-streaming
        for tm in tm_cands:                   # then largest row tile that fits
            if usage(tm, th) <= budget:
                return tm, th, usage(tm, th)
    tm, th = tm_cands[-1], th_cands[-1]
    return tm, th, usage(tm, th)


def feed_forward(x, w1, b1, w2, b2, *, use_bf16_matmul=None, approximate_gelu=False,
                 th_override=None):
    """FeedForward forward: Linear(D->H) -> GELU -> Dropout -> Linear(H->D) -> Dropout.

    x: [B, S, D]; w1: [D, H]; b1: [H]; w2: [H, D]; b2: [D]. Dropout == identity (eval mode).

    use_bf16_matmul: None (auto: True for f32/bf16 inputs) / True / False.  bf16 operands run
        the native single-pass MXU path with f32 accumulation; False keeps exact-f32 matmuls.
    approximate_gelu: use tanh-approx GELU (EUP) instead of exact erf (torch default).
    th_override: force a hidden-dim tile (testing / manual tuning); must divide H.
    """
    B, S, D = x.shape
    H = w1.shape[1]
    M = B * S

    in_dtype = x.dtype
    if use_bf16_matmul is None:
        use_bf16_matmul = in_dtype in (jnp.float32, jnp.bfloat16)
    mm_dtype = jnp.bfloat16 if use_bf16_matmul else in_dtype
    isz = jnp.dtype(mm_dtype).itemsize
    osz = jnp.dtype(in_dtype).itemsize

    # --- generation-aware VMEM budget & tile selection ---
    cap = _vmem_capacity_bytes()
    budget = int(cap * 0.85)
    tm, th, usage = _choose_tiles(M, D, H, isz, osz, budget)

    if th_override is not None:
        assert H % th_override == 0, "th_override must divide H"
        th = th_override

    # Avoid the jnp.pad copy of x when a nearby tm divides M exactly.
    if M % tm != 0 and M % 8 == 0:
        for cand in range(tm - 8, max(8, tm // 2) - 1, -8):
            if M % cand == 0:
                tm = cand
                break
    Mp = _round_up(M, tm)
    n_rows = Mp // tm
    n_h = H // th if H % th == 0 else 1
    if H % th != 0:
        th = H

    # --- operand prep ---
    x2d = x.reshape(M, D)
    if Mp != M:
        x2d = jnp.pad(x2d, ((0, Mp - M), (0, 0)))
    x2d = x2d.astype(mm_dtype)
    w1c = w1.astype(mm_dtype)
    w2c = w2.astype(mm_dtype)
    b1_2d = b1.reshape(1, H).astype(jnp.float32)
    b2_2d = b2.reshape(1, D).astype(jnp.float32)

    vmem_limit = int(min(int(cap * 0.9), max(usage + (4 << 20), 32 << 20)))

    # Honest traffic estimate: weights stream once when n_h == 1, once per row tile otherwise.
    weight_bytes = (D * H + H * D) * isz + (H + D) * 4
    weight_reads = 1 if n_h == 1 else n_rows
    cost = pl.CostEstimate(
        flops=4 * Mp * D * H,
        transcendentals=Mp * H,
        bytes_accessed=Mp * D * isz + weight_reads * weight_bytes + Mp * D * osz,
    )

    if n_h == 1:
        kernel = functools.partial(_ffn_kernel_single, approximate_gelu)
        grid = (n_rows,)
        in_specs = [
            pl.BlockSpec((tm, D), lambda i: (i, 0)),   # x row tile
            pl.BlockSpec((D, H), lambda i: (0, 0)),    # W1 (fetched once)
            pl.BlockSpec((1, H), lambda i: (0, 0)),    # b1
            pl.BlockSpec((H, D), lambda i: (0, 0)),    # W2 (fetched once)
            pl.BlockSpec((1, D), lambda i: (0, 0)),    # b2
        ]
        out_specs = pl.BlockSpec((tm, D), lambda i: (i, 0))
        scratch = []
        dim_sem = ("parallel",)
    else:
        kernel = functools.partial(_ffn_kernel_multi, approximate_gelu)
        grid = (n_rows, n_h)
        in_specs = [
            pl.BlockSpec((tm, D), lambda i, h: (i, 0)),   # x row tile
            pl.BlockSpec((D, th), lambda i, h: (0, h)),   # W1 H-slice
            pl.BlockSpec((1, th), lambda i, h: (0, h)),   # b1 H-slice
            pl.BlockSpec((th, D), lambda i, h: (h, 0)),   # W2 H-slice
            pl.BlockSpec((1, D), lambda i, h: (0, 0)),    # b2
        ]
        out_specs = pl.BlockSpec((tm, D), lambda i, h: (i, 0))
        scratch = [pltpu.VMEM((tm, D), jnp.float32)]
        dim_sem = ("parallel", "arbitrary")

    out2d = pl.pallas_call(
        kernel,
        out_shape=jax.ShapeDtypeStruct((Mp, D), in_dtype),
        grid_spec=pltpu.PrefetchScalarGridSpec(
            num_scalar_prefetch=0,
            grid=grid,
            in_specs=in_specs,
            out_specs=out_specs,
            scratch_shapes=scratch,
        ),
        compiler_params=pltpu.CompilerParams(
            dimension_semantics=dim_sem,
            vmem_limit_bytes=vmem_limit,
        ),
        cost_estimate=cost,
    )(x2d, w1c, b1_2d, w2c, b2_2d)

    if Mp != M:
        out2d = out2d[:M]
    return out2d.reshape(B, S, D)


def init_params(key, dim, hidden_dim, dtype=jnp.float32):
    """Deterministic init mimicking PyTorch nn.Linear defaults
    (uniform(-1/sqrt(fan_in), 1/sqrt(fan_in)))."""
    k1, k2, k3, k4 = jax.random.split(key, 4)
    bound1 = 1.0 / math.sqrt(dim)
    bound2 = 1.0 / math.sqrt(hidden_dim)
    w1 = jax.random.uniform(k1, (dim, hidden_dim), dtype, -bound1, bound1)
    b1 = jax.random.uniform(k2, (hidden_dim,), dtype, -bound1, bound1)
    w2 = jax.random.uniform(k3, (hidden_dim, dim), dtype, -bound2, bound2)
    b2 = jax.random.uniform(k4, (dim,), dtype, -bound2, bound2)
    return w1, b1, w2, b2


def _ref_ffn(x, w1, b1, w2, b2):
    hp = jax.lax.Precision.HIGHEST
    h = jnp.dot(x, w1, precision=hp) + b1
    h = 0.5 * h * (1.0 + jax.lax.erf(h * _INV_SQRT2))
    return jnp.dot(h, w2, precision=hp) + b2


if __name__ == "__main__":
    key = jax.random.PRNGKey(0)
    kx, kp = jax.random.split(key)

    # --- Case 1: module-spec shapes; single-H-tile fast path (weights fetched once) ---
    B, S, dim, hidden_dim = 2, 8, 32, 64
    x = jax.random.normal(kx, (B, S, dim), dtype=jnp.float32)
    w1, b1, w2, b2 = init_params(kp, dim, hidden_dim)
    ref = _ref_ffn(x, w1, b1, w2, b2)

    out_bf16 = jax.block_until_ready(feed_forward(x, w1, b1, w2, b2))  # auto bf16 MXU path
    out_f32 = jax.block_until_ready(
        feed_forward(x, w1, b1, w2, b2, use_bf16_matmul=False))

    assert out_bf16.shape == (B, S, dim)
    assert jnp.allclose(out_f32, ref, atol=1e-4, rtol=1e-4), "f32 path mismatch"
    assert jnp.allclose(out_bf16, ref, atol=5e-2, rtol=5e-2), "bf16 path mismatch"

    # --- Case 2: force H tiling (n_h > 1) to exercise the accumulating reduction path ---
    dim2, hidden2 = 128, 256
    kx2, kp2 = jax.random.split(kp)
    x2 = jax.random.normal(kx2, (B, S, dim2), dtype=jnp.float32)
    p2 = init_params(kp2, dim2, hidden2)
    out2 = jax.block_until_ready(
        feed_forward(x2, *p2, use_bf16_matmul=False, th_override=128))
    ref2 = _ref_ffn(x2, *p2)
    assert jnp.allclose(out2, ref2, atol=1e-4, rtol=1e-4), "H-tiled path mismatch"

    print("KERNEL_OK")
</pallas_src>

<mosaic_0001>
module attributes {stable_mosaic.version = 11 : i64} {
  func.func @_ffn_kernel_single(%arg0: i32, %arg1: memref<16x32xbf16, #tpu.memory_space<vmem>>, %arg2: memref<32x64xbf16, #tpu.memory_space<vmem>>, %arg3: memref<1x64xf32, #tpu.memory_space<vmem>>, %arg4: memref<64x32xbf16, #tpu.memory_space<vmem>>, %arg5: memref<1x32xf32, #tpu.memory_space<vmem>>, %arg6: memref<16x32xf32, #tpu.memory_space<vmem>>) attributes {dimension_semantics = [#tpu.dimension_semantics<parallel>], iteration_bounds = array<i64: 1>, scalar_prefetch = 0 : i64, scratch_operands = 0 : i64, tpu.core_type = #tpu.core_type<tc>, window_params = [{transform_indices = @transform_0, window_bounds = array<i64: 16, 32>}, {pipeline_mode = #tpu.pipeline_mode<synchronous>, transform_indices = @transform_1, window_bounds = array<i64: 32, 64>}, {pipeline_mode = #tpu.pipeline_mode<synchronous>, transform_indices = @transform_2, window_bounds = array<i64: 1, 64>}, {pipeline_mode = #tpu.pipeline_mode<synchronous>, transform_indices = @transform_3, window_bounds = array<i64: 64, 32>}, {pipeline_mode = #tpu.pipeline_mode<synchronous>, transform_indices = @transform_4, window_bounds = array<i64: 1, 32>}, {transform_indices = @transform_5, window_bounds = array<i64: 16, 32>}]} {
    %c0 = arith.constant 0 : index
    %c0_0 = arith.constant 0 : index
    %0 = vector.load %arg1[%c0, %c0_0] : memref<16x32xbf16, #tpu.memory_space<vmem>>, vector<16x32xbf16>
    %c0_1 = arith.constant 0 : index
    %c0_2 = arith.constant 0 : index
    %1 = vector.load %arg2[%c0_1, %c0_2] : memref<32x64xbf16, #tpu.memory_space<vmem>>, vector<32x64xbf16>
    %cst = arith.constant dense<0.000000e+00> : vector<16x64xf32>
    %2 = tpu.matmul %0, %1, %cst {dimension_numbers = #tpu.dot_dimension_numbers<[1], [0], [0], [1], [0, 0, 1, 1], [], []>} : vector<16x32xbf16>, vector<32x64xbf16>, vector<16x64xf32> -> vector<16x64xf32>
    %c0_3 = arith.constant 0 : index
    %c0_4 = arith.constant 0 : index
    %3 = vector.load %arg3[%c0_3, %c0_4] : memref<1x64xf32, #tpu.memory_space<vmem>>, vector<1x64xf32>
    %4 = vector.broadcast %3 : vector<1x64xf32> to vector<16x64xf32>
    %5 = arith.addf %2, %4 : vector<16x64xf32>
    %cst_5 = arith.constant 5.000000e-01 : f32
    %6 = vector.broadcast %cst_5 : f32 to vector<16x64xf32>
    %7 = arith.mulf %6, %5 : vector<16x64xf32>
    %cst_6 = arith.constant 0.707106769 : f32
    %8 = vector.broadcast %cst_6 : f32 to vector<16x64xf32>
    %9 = arith.mulf %5, %8 : vector<16x64xf32>
    %10 = math.erf %9 : vector<16x64xf32>
    %cst_7 = arith.constant 1.000000e+00 : f32
    %11 = vector.broadcast %cst_7 : f32 to vector<16x64xf32>
    %12 = arith.addf %11, %10 : vector<16x64xf32>
    %13 = arith.mulf %7, %12 : vector<16x64xf32>
    %14 = arith.truncf %13 : vector<16x64xf32> to vector<16x64xbf16>
    %c0_8 = arith.constant 0 : index
    %c0_9 = arith.constant 0 : index
    %15 = vector.load %arg4[%c0_8, %c0_9] : memref<64x32xbf16, #tpu.memory_space<vmem>>, vector<64x32xbf16>
    %cst_10 = arith.constant dense<0.000000e+00> : vector<16x32xf32>
    %16 = tpu.matmul %14, %15, %cst_10 {dimension_numbers = #tpu.dot_dimension_numbers<[1], [0], [0], [1], [0, 0, 1, 1], [], []>} : vector<16x64xbf16>, vector<64x32xbf16>, vector<16x32xf32> -> vector<16x32xf32>
    %c0_11 = arith.constant 0 : index
    %c0_12 = arith.constant 0 : index
    %17 = vector.load %arg5[%c0_11, %c0_12] : memref<1x32xf32, #tpu.memory_space<vmem>>, vector<1x32xf32>
    %18 = vector.broadcast %17 : vector<1x32xf32> to vector<16x32xf32>
    %19 = arith.addf %16, %18 : vector<16x32xf32>
    %c0_13 = arith.constant 0 : index
    %c0_14 = arith.constant 0 : index
    %20 = vector.load %arg6[%c0_13, %c0_14] : memref<16x32xf32, #tpu.memory_space<vmem>>, vector<16x32xf32>
    tpu.vector_store %arg6[%c0_13, %c0_14], %19 {strides = array<i32>} : memref<16x32xf32, #tpu.memory_space<vmem>>, vector<16x32xf32>,
    return
  }
  func.func @transform_0(%arg0: i32) -> (i32, i32) {
    %c0_i32 = arith.constant 0 : i32
    %c0_i32_0 = arith.constant 0 : i32
    return %arg0, %c0_i32 : i32, i32
  }
  func.func @transform_1(%arg0: i32) -> (i32, i32) {
    %c0_i32 = arith.constant 0 : i32
    %c0_i32_0 = arith.constant 0 : i32
    %c0_i32_1 = arith.constant 0 : i32
    return %c0_i32, %c0_i32_0 : i32, i32
  }
  func.func @transform_2(%arg0: i32) -> (i32, i32) {
    %c0_i32 = arith.constant 0 : i32
    %c0_i32_0 = arith.constant 0 : i32
    %c0_i32_1 = arith.constant 0 : i32
    return %c0_i32, %c0_i32_0 : i32, i32
  }
  func.func @transform_3(%arg0: i32) -> (i32, i32) {
    %c0_i32 = arith.constant 0 : i32
    %c0_i32_0 = arith.constant 0 : i32
    %c0_i32_1 = arith.constant 0 : i32
    return %c0_i32, %c0_i32_0 : i32, i32
  }
  func.func @transform_4(%arg0: i32) -> (i32, i32) {
    %c0_i32 = arith.constant 0 : i32
    %c0_i32_0 = arith.constant 0 : i32
    %c0_i32_1 = arith.constant 0 : i32
    return %c0_i32, %c0_i32_0 : i32, i32
  }
  func.func @transform_5(%arg0: i32) -> (i32, i32) {
    %c0_i32 = arith.constant 0 : i32
    %c0_i32_0 = arith.constant 0 : i32
    return %arg0, %c0_i32 : i32, i32
  }
}

</mosaic_0001>

<bundles_post_ra>
// kernel: tpu_custom_call.1
= control target key start
LH: loop header
LB: loop body
LE: loop exit
PB: predicated region body
PF: predicated region fallthrough
CT: control target
= control target key end

     0   :  { %v289_v1 = vmov 0.0   ;;  %vm290_vm0 = vmmov 0   ;;  %vm52_vm1 = vcmask 261120   ;;  %s366_s0 = inlined_call_operand.vmem [shape: bf16[16,32], index: 0, kind: input, shape index: {}]   ;;  %s367_s1 = inlined_call_operand.vmem [shape: bf16[32,64], index: 1, kind: input, shape index: {}]   ;;  %s368_s2 = inlined_call_operand.vmem [shape: f32[1,64], index: 2, kind: input, shape index: {}]   ;;  %s369_s3 = inlined_call_operand.vmem [shape: bf16[64,32], index: 3, kind: input, shape index: {}]   ;;  %s370_s4 = inlined_call_operand.vmem [shape: f32[1,32], index: 4, kind: input, shape index: {}]   ;;  %s371_s5 = inlined_call_operand.hbm [shape: f32[16,32], index: 5, kind: output, shape index: {}]  }
   0x1   :  { %v254_v0 = vld [vmem:[%s367_s1] sm:$0xff]   ;;  %229 = vmatprep.subr.bf16.mxu0 %v289_v1  ;;  %237 = vmatprep.subr.bf16.mxu1 %v289_v1  ;;  %v255_v2 = vld [vmem:[%s367_s1 + $0x8] sm:$0xff]  }
   0x2   :  { %230 = vmatpush3.bf16.msra.mxu0 %v254_v0  ;;  %233 = vmatprep.mubr.msk.bf16.mxu0 %vm290_vm0, %v289_v1  ;;  %v256_v3 = vld [vmem:[%s366_s0] sm:$0xff]  }
   0x3   :  { %231 = vmatprep.subr.bf16.mxu0 %v289_v1  ;;  %245 = vmatprep.mubr.msk.bf16.mxu1 %vm290_vm0, %v289_v1 }
   0x6   :  { %232 = vmatpush3.bf16.msra.mxu0 %v255_v2 }
   0x7   :  { %10 = vsyncpa [#allocation3], 0  ;;  %v257_v4 = vld [vmem:[%s369_s3] sm:$0xff]   ;;  %v258_v5 = vld [vmem:[%s369_s3 + $0x8] sm:$0xff]   ;;  %vm147_vm2 = vcmask 523264   ;;  %s291_s7 = smov [#allocation2]  }
   0x8   :  { %238 = vmatpush3.bf16.msra.mxu1 %v257_v4  ;;  %v259_v6 = vld [vmem:[%s369_s3 + $0x10] sm:$0xff]   ;;  %v260_v7 = vld [vmem:[%s369_s3 + $0x18] sm:$0xff]   ;;  %v210_v8 = vld [vmem:[%s368_s2] ss:$0 sm:$0xff]  ;;  %s199_s8 = sshll.u32 %s291_s7, 4  ;;  %s200_s8 = int_to_ptr.vmem [resolvable:$true] %s199_s8 }
   0x9   :  { %234 = vmatmul.mubr.msk.bf16.vlgmr.msra.gmra.mrb[0].mxu0 %vm52_vm1, %v256_v3  ;;  %239 = vmatprep.subr.bf16.mxu1 %v289_v1  ;;  %v215_v26 = vld [vmem:[%s370_s4] ss:$0 sm:$0xff]  ;;  %s265_s9 = scalar_lea.vmem %s200_s8, 256  ;;  %p270_p1 = scmp.lt.s32.totalorder %s200_s8, %s200_s8 }
   0xa   :  { %p266_p0 = scmp.ne.s32.totalorder %s200_s8, %s265_s9  ;;  %p271_p2 = scmp.lt.s32.totalorder %s265_s9, %s265_s9 }
   0xc   :  { %240 = vmatpush3.bf16.msra.mxu1 %v258_v5  ;;  %p272_p3 = por %p271_p2, %p270_p1 }
   0xd   :  { %241 = vmatprep.subr.bf16.mxu1 %v289_v1 }
   0xe   :  { %p273_p4 = pnand %p272_p3, %p266_p0 }
  0x10   :  { %242 = vmatpush3.bf16.msra.mxu1 %v259_v6 }
  0x11   :  { %243 = vmatprep.subr.bf16.mxu1 %v289_v1 }
  0x14   :  { %244 = vmatpush3.bf16.msra.mxu1 %v260_v7 }
  0xdc   :  { %v90_v9 = vpop.f32.mrb[0].mxu0 }
  0xdd   :  { %v91_v10 = vadd.f32 %v210_v8, %v90_v9  ;;  %v235_v11 = vpop.f32.mrb[1].mxu0 }
  0xde   :  { %v93_v12 = vpop.f32.mrb[2].mxu0 }
  0xdf   :  { %v99_v13 = vmul.f32 0.70710677, %v91_v10  ;;  %v94_v14 = vadd.f32 %v210_v8, %v93_v12  ;;  %v236_v15 = vpop.f32.mrb[3].mxu0  ;;  %v97_v20 = vmul.f32 0.5, %v91_v10 }
  0xe1   :  { %261 = verf.f32 %v99_v13  ;;  %v100_v16 = vmul.f32 0.70710677, %v94_v14  ;;  %v98_v21 = vmul.f32 0.5, %v94_v14 }
  0xe3   :  { %263 = verf.f32 %v100_v16 }
  0xeb   :  { %v262_v17 = vpop.eup %261 }
  0xec   :  { %v103_v18 = vadd.f32 1.0, %v262_v17 }
  0xed   :  { %v264_v19 = vpop.eup %263 }
  0xee   :  { %v104_v22 = vadd.f32 1.0, %v264_v19  ;;  %v105_v23 = vmul.f32 %v103_v18, %v97_v20 }
  0xf0   :  { %v106_v24 = vmul.f32 %v104_v22, %v98_v21 }
  0xf2   :  { %v107_v25 = vpack.c.bf16 %v106_v24, %v105_v23 }
  0xf4   :  { %246 = vmatmul.mubr.msk.bf16.vlgmr.msra.gmra.mrb[0].mxu1 %vm147_vm2, %v107_v25 }
 0x1c7   :  { %v185_v27 = vpop.f32.mrb[0].mxu1 }
 0x1c8   :  { %v186_v28 = vadd.f32 %v215_v26, %v185_v27  ;;  %v247_v29 = vpop.f32.mrb[1].mxu1 }
 0x1c9   :  { %v188_v30 = vpop.f32.mrb[2].mxu1 }
 0x1ca   :  { %192 = vst.msk [vmem:[#allocation2] sm:$0xff] %vm52_vm1, %v186_v28  ;;  %v189_v31 = vadd.f32 %v215_v26, %v188_v30  ;;  %v248_v32 = vpop.f32.mrb[3].mxu1 }
 0x1cc   :  { %193 = vst.msk [vmem:[#allocation2 + $0x8] sm:$0xff] %vm52_vm1, %v189_v31 }
 0x1cd   :  { %276 = shalt.err (!%p273_p4)
}
 0x1ce   :  { %s277_s11 = scalar_lea.hbm %s371_s5, 256 }
 0x1cf   :  { %p278_p5 = scmp.ne.s32.totalorder %s371_s5, %s277_s11  ;;  %p281_p6 = scmp.lt.u32.totalorder %s277_s11, %s371_s5 }
 0x1d1   :  { %p283_p7 = pnand %p281_p6, %p278_p5 }
 0x1d3   :  { %286 = shalt.err (!%p283_p7)
}
 0x1d4   :  { %s292_s16 = smov 128   ;;  %s293_s17 = smov 8  }
 0x1d5   :  { %205 = dma.vmem_to_hbm [thread:$0]  %s200_s8, 256, %s371_s5, [#allocation3], %s292_s16, %s292_s16, %s293_s17  }
 0x1d6   :  { %287 = dma.done.wait [#allocation3], 256  }
 0x1d7   :  { %288 = vsyncadd [#allocation3], 4294967040 }
 0x1d8   :  { %209 = vsyncpa [#allocation3], 1 }

</bundles_post_ra>
